<compile_context>
chip_gen: v5e
topology: v5e:2x2
jax: 0.10.0
libtpu: 0.0.40
codegen_flags: <defaults>
</compile_context>

<pallas_src>
import functools

import jax
import jax.numpy as jnp
from jax.experimental import pallas as pl
from jax.experimental.pallas import tpu as pltpu


def _round_up(x, m):
    return ((x + m - 1) // m) * m


def _residual_linear_kernel(x_ref, w_ref, b_ref, o_ref, *scratch):
    # x_ref: (tm, th) A-tile of x      -> block (i, k)
    # w_ref: (th, th) W tile           -> block (k, j)
    # b_ref: (1,  th) bias tile        -> block (0, j)
    # o_ref: (tm, th) output tile      -> block (i, j), resident across k
    # scratch: optional f32 accumulator (only for non-f32 outputs)
    acc_ref = scratch[0] if scratch else o_ref
    j = pl.program_id(1)
    k = pl.program_id(2)

    @pl.when(k == 0)
    def _():
        acc_ref[...] = jnp.zeros_like(acc_ref)

    acc_ref[...] += jnp.dot(
        x_ref[...], w_ref[...], preferred_element_type=jnp.float32
    )

    # Residual fusion: tn == tk, so the A-tile at k == j is exactly
    # x[i*tm:(i+1)*tm, j*th:(j+1)*th] -- no separate residual stream needed.
    @pl.when(k == j)
    def _():
        acc_ref[...] += x_ref[...].astype(jnp.float32)

    @pl.when(k == pl.num_programs(2) - 1)
    def _():
        out = acc_ref[...] + b_ref[...].astype(jnp.float32)
        o_ref[...] = out.astype(o_ref.dtype)


@functools.partial(jax.jit, static_argnames=("tm", "th"))
def residual_linear(x, w, b, *, tm=1024, th=512):
    """out = (x @ w + b) + x, with x of shape (B, S, H), w (H, H), b (H,)."""
    B, S, H = x.shape
    M = B * S
    out_dtype = x.dtype
    in_itemsize = jnp.dtype(x.dtype).itemsize
    out_itemsize = jnp.dtype(out_dtype).itemsize

    # Sublane packing: f32 -> 8 rows per vreg, bf16 -> 16, int8/fp8 -> 32.
    sub = max(8, 32 // in_itemsize)

    # tm: sublane axis, multiple of `sub`.  th: lane axis, multiple of 128.
    # tn == tk == th is REQUIRED by the k == j residual fusion above.
    tm = _round_up(min(tm, _round_up(M, sub)), sub)
    th = min(th, _round_up(H, 128))

    Mp = _round_up(M, tm)
    Hp = _round_up(H, th)

    # ---- zero-pad to tile multiples (no-op on the aligned hot path) ---------
    x2 = x.reshape(M, H)
    need_pad = (Mp != M) or (Hp != H)
    x_p = jnp.pad(x2, ((0, Mp - M), (0, Hp - H))) if need_pad else x2
    w_p = jnp.pad(w, ((0, Hp - H), (0, Hp - H))) if Hp != H else w
    b_p = (jnp.pad(b, (0, Hp - H)) if Hp != H else b).reshape(1, Hp)

    grid = (Mp // tm, Hp // th, Hp // th)

    # f32 outputs accumulate in-place in the resident output tile; lower
    # precision outputs get a dedicated f32 VMEM accumulator.
    use_scratch = out_dtype != jnp.float32
    scratch_shapes = [pltpu.VMEM((tm, th), jnp.float32)] if use_scratch else []

    cost = pl.CostEstimate(
        flops=2 * Mp * Hp * Hp + 2 * Mp * Hp,
        transcendentals=0,
        bytes_accessed=(
            Mp * Hp * (Hp // th) * in_itemsize      # x, re-streamed per j
            + Hp * Hp * (Mp // tm) * in_itemsize    # w, re-streamed per i
            + Hp * (Mp // tm) * in_itemsize         # bias
            + Mp * Hp * out_itemsize                # output, written once
        ),
    )

    out_p = pl.pallas_call(
        _residual_linear_kernel,
        out_shape=jax.ShapeDtypeStruct((Mp, Hp), out_dtype),
        grid_spec=pltpu.PrefetchScalarGridSpec(
            num_scalar_prefetch=0,
            grid=grid,
            in_specs=[
                pl.BlockSpec((tm, th), lambda i, j, k: (i, k)),   # x (A-tile)
                pl.BlockSpec((th, th), lambda i, j, k: (k, j)),   # w
                pl.BlockSpec((1, th), lambda i, j, k: (0, j)),    # bias
            ],
            out_specs=pl.BlockSpec((tm, th), lambda i, j, k: (i, j)),
            scratch_shapes=scratch_shapes,
        ),
        compiler_params=pltpu.CompilerParams(
            dimension_semantics=("parallel", "parallel", "arbitrary"),
            vmem_limit_bytes=32 * 1024 * 1024,
        ),
        cost_estimate=cost,
    )(x_p, w_p, b_p)

    out2 = out_p[:M, :H] if need_pad else out_p
    return out2.reshape(B, S, H)


if __name__ == "__main__":
    key = jax.random.PRNGKey(0)
    kx, kw, kb = jax.random.split(key, 3)

    # Small shape implied by Residual(Linear(H, H)) applied to (B, S, H).
    B, S, H = 2, 8, 32
    x = jax.random.normal(kx, (B, S, H), dtype=jnp.float32)
    # Deterministic "Linear" params (synthetic init, not a checkpoint load).
    w = jax.random.normal(kw, (H, H), dtype=jnp.float32) * (1.0 / (H ** 0.5))
    b = jax.random.normal(kb, (H,), dtype=jnp.float32) * 0.01

    out = jax.block_until_ready(residual_linear(x, w, b))
    ref = (x @ w + b) + x
    assert out.shape == (B, S, H)
    assert jnp.allclose(out, ref, atol=1e-5, rtol=1e-5), "small-shape mismatch"

    # Larger sanity check exercising the multi-block (i, j, k) path, the
    # k == j residual fusion across several tiles, and the no-padding path.
    B2, S2, H2 = 2, 1024, 1024
    kx2, kw2, kb2 = jax.random.split(jax.random.PRNGKey(1), 3)
    x2 = jax.random.normal(kx2, (B2, S2, H2), dtype=jnp.float32)
    w2 = jax.random.normal(kw2, (H2, H2), dtype=jnp.float32) * (1.0 / (H2 ** 0.5))
    b2 = jax.random.normal(kb2, (H2,), dtype=jnp.float32) * 0.01

    out2 = jax.block_until_ready(residual_linear(x2, w2, b2))
    ref2 = (
        jnp.einsum("bsh,hk->bsk", x2, w2, precision=jax.lax.Precision.HIGHEST)
        + b2
        + x2
    )
    assert jnp.allclose(out2, ref2, atol=5e-2, rtol=5e-2), "large-shape mismatch"

    print("KERNEL_OK")
</pallas_src>

<mosaic_0001>
module attributes {stable_mosaic.version = 11 : i64} {
  func.func @_residual_linear_kernel(%arg0: i32, %arg1: i32, %arg2: i32, %arg3: memref<16x128xf32, #tpu.memory_space<vmem>>, %arg4: memref<128x128xf32, #tpu.memory_space<vmem>>, %arg5: memref<1x128xf32, #tpu.memory_space<vmem>>, %arg6: memref<16x128xf32, #tpu.memory_space<vmem>>) attributes {dimension_semantics = [#tpu.dimension_semantics<parallel>, #tpu.dimension_semantics<parallel>, #tpu.dimension_semantics<arbitrary>], iteration_bounds = array<i64: 1, 1, 1>, scalar_prefetch = 0 : i64, scratch_operands = 0 : i64, tpu.core_type = #tpu.core_type<tc>, window_params = [{transform_indices = @transform_0, window_bounds = array<i64: 16, 128>}, {transform_indices = @transform_1, window_bounds = array<i64: 128, 128>}, {transform_indices = @transform_2, window_bounds = array<i64: 1, 128>}, {transform_indices = @transform_3, window_bounds = array<i64: 16, 128>}]} {
    %c0_i32 = arith.constant 0 : i32
    %0 = arith.cmpi eq, %arg2, %c0_i32 : i32
    %1 = arith.extui %0 : i1 to i32
    %c0_i32_0 = arith.constant 0 : i32
    %2 = arith.cmpi ne, %1, %c0_i32_0 : i32
    scf.if %2 {
      %cst_11 = arith.constant 0.000000e+00 : f32
      %15 = vector.broadcast %cst_11 : f32 to vector<16x128xf32>
      %c0_12 = arith.constant 0 : index
      %c0_13 = arith.constant 0 : index
      %16 = vector.load %arg6[%c0_12, %c0_13] : memref<16x128xf32, #tpu.memory_space<vmem>>, vector<16x128xf32>
      tpu.vector_store %arg6[%c0_12, %c0_13], %15 {strides = array<i32>} : memref<16x128xf32, #tpu.memory_space<vmem>>, vector<16x128xf32>,
    } else {
    }
    %c0 = arith.constant 0 : index
    %c0_1 = arith.constant 0 : index
    %3 = vector.load %arg6[%c0, %c0_1] : memref<16x128xf32, #tpu.memory_space<vmem>>, vector<16x128xf32>
    %c0_2 = arith.constant 0 : index
    %c0_3 = arith.constant 0 : index
    %4 = vector.load %arg3[%c0_2, %c0_3] : memref<16x128xf32, #tpu.memory_space<vmem>>, vector<16x128xf32>
    %c0_4 = arith.constant 0 : index
    %c0_5 = arith.constant 0 : index
    %5 = vector.load %arg4[%c0_4, %c0_5] : memref<128x128xf32, #tpu.memory_space<vmem>>, vector<128x128xf32>
    %cst = arith.constant dense<0.000000e+00> : vector<16x128xf32>
    %6 = tpu.matmul %4, %5, %cst {dimension_numbers = #tpu.dot_dimension_numbers<[1], [0], [0], [1], [0, 0, 1, 1], [], []>} : vector<16x128xf32>, vector<128x128xf32>, vector<16x128xf32> -> vector<16x128xf32>
    %7 = arith.addf %3, %6 : vector<16x128xf32>
    %c0_6 = arith.constant 0 : index
    %c0_7 = arith.constant 0 : index
    %8 = vector.load %arg6[%c0_6, %c0_7] : memref<16x128xf32, #tpu.memory_space<vmem>>, vector<16x128xf32>
    tpu.vector_store %arg6[%c0_6, %c0_7], %7 {strides = array<i32>} : memref<16x128xf32, #tpu.memory_space<vmem>>, vector<16x128xf32>,
    %9 = arith.cmpi eq, %arg2, %arg1 : i32
    %10 = arith.extui %9 : i1 to i32
    %c0_i32_8 = arith.constant 0 : i32
    %11 = arith.cmpi ne, %10, %c0_i32_8 : i32
    scf.if %11 {
      %c0_11 = arith.constant 0 : index
      %c0_12 = arith.constant 0 : index
      %15 = vector.load %arg6[%c0_11, %c0_12] : memref<16x128xf32, #tpu.memory_space<vmem>>, vector<16x128xf32>
      %c0_13 = arith.constant 0 : index
      %c0_14 = arith.constant 0 : index
      %16 = vector.load %arg3[%c0_13, %c0_14] : memref<16x128xf32, #tpu.memory_space<vmem>>, vector<16x128xf32>
      %17 = arith.addf %15, %16 : vector<16x128xf32>
      %c0_15 = arith.constant 0 : index
      %c0_16 = arith.constant 0 : index
      %18 = vector.load %arg6[%c0_15, %c0_16] : memref<16x128xf32, #tpu.memory_space<vmem>>, vector<16x128xf32>
      tpu.vector_store %arg6[%c0_15, %c0_16], %17 {strides = array<i32>} : memref<16x128xf32, #tpu.memory_space<vmem>>, vector<16x128xf32>,
    } else {
    }
    %c0_i32_9 = arith.constant 0 : i32
    %12 = arith.cmpi eq, %arg2, %c0_i32_9 : i32
    %13 = arith.extui %12 : i1 to i32
    %c0_i32_10 = arith.constant 0 : i32
    %14 = arith.cmpi ne, %13, %c0_i32_10 : i32
    scf.if %14 {
      %c0_11 = arith.constant 0 : index
      %c0_12 = arith.constant 0 : index
      %15 = vector.load %arg6[%c0_11, %c0_12] : memref<16x128xf32, #tpu.memory_space<vmem>>, vector<16x128xf32>
      %c0_13 = arith.constant 0 : index
      %c0_14 = arith.constant 0 : index
      %16 = vector.load %arg5[%c0_13, %c0_14] : memref<1x128xf32, #tpu.memory_space<vmem>>, vector<1x128xf32>
      %17 = vector.broadcast %16 : vector<1x128xf32> to vector<16x128xf32>
      %18 = arith.addf %15, %17 : vector<16x128xf32>
      %c0_15 = arith.constant 0 : index
      %c0_16 = arith.constant 0 : index
      %19 = vector.load %arg6[%c0_15, %c0_16] : memref<16x128xf32, #tpu.memory_space<vmem>>, vector<16x128xf32>
      tpu.vector_store %arg6[%c0_15, %c0_16], %18 {strides = array<i32>} : memref<16x128xf32, #tpu.memory_space<vmem>>, vector<16x128xf32>,
    } else {
    }
    return
  }
  func.func @transform_0(%arg0: i32, %arg1: i32, %arg2: i32) -> (i32, i32) {
    %c0_i32 = arith.constant 0 : i32
    return %arg0, %arg2 : i32, i32
  }
  func.func @transform_1(%arg0: i32, %arg1: i32, %arg2: i32) -> (i32, i32) {
    %c0_i32 = arith.constant 0 : i32
    return %arg2, %arg1 : i32, i32
  }
  func.func @transform_2(%arg0: i32, %arg1: i32, %arg2: i32) -> (i32, i32) {
    %c0_i32 = arith.constant 0 : i32
    %c0_i32_0 = arith.constant 0 : i32
    return %c0_i32, %arg1 : i32, i32
  }
  func.func @transform_3(%arg0: i32, %arg1: i32, %arg2: i32) -> (i32, i32) {
    %c0_i32 = arith.constant 0 : i32
    return %arg0, %arg1 : i32, i32
  }
}

</mosaic_0001>

<bundles_post_ra>
// kernel: residual_linear.1
= control target key start
LH: loop header
LB: loop body
LE: loop exit
PB: predicated region body
PF: predicated region fallthrough
CT: control target
= control target key end

     0   :  { %s197_s1 = inlined_call_operand.vmem [shape: f32[128,128], index: 1, kind: input, shape index: {}]   ;;  %s198_s2 = inlined_call_operand.vmem [shape: f32[1,128], index: 2, kind: input, shape index: {}]   ;;  %s199_s0 = inlined_call_operand.vmem [shape: f32[16,128], index: 0, kind: input, shape index: {}]   ;;  %s200_s3 = inlined_call_operand.vmem [shape: f32[16,128], index: 3, kind: output, shape index: {}]  }
   0x1   :  { %v39_v0 = vld [vmem:[%s197_s1 + $0x78] sm:$0xff]  ;;  %v38_v1 = vld [vmem:[%s197_s1 + $0x70] sm:$0xff]  ;;  %v37_v2 = vld [vmem:[%s197_s1 + $0x68] sm:$0xff] }
   0x2   :  { %40 = vmatpush.msra.mxu0 %v39_v0  ;;  %96 = vmatpush.msra.mxu1 %v39_v0  ;;  %v36_v3 = vld [vmem:[%s197_s1 + $0x60] sm:$0xff]  ;;  %v35_v4 = vld [vmem:[%s197_s1 + $0x58] sm:$0xff]  ;;  %v34_v5 = vld [vmem:[%s197_s1 + $0x50] sm:$0xff] }
   0x3   :  { %v33_v6 = vld [vmem:[%s197_s1 + $0x48] sm:$0xff]  ;;  %v32_v7 = vld [vmem:[%s197_s1 + $0x40] sm:$0xff]  ;;  %v31_v8 = vld [vmem:[%s197_s1 + $0x38] sm:$0xff] }
   0x4   :  { %41 = vmatpush.msra.mxu0 %v38_v1  ;;  %97 = vmatpush.msra.mxu1 %v38_v1  ;;  %v30_v9 = vld [vmem:[%s197_s1 + $0x30] sm:$0xff]  ;;  %v29_v10 = vld [vmem:[%s197_s1 + $0x28] sm:$0xff]  ;;  %v28_v11 = vld [vmem:[%s197_s1 + $0x20] sm:$0xff] }
   0x5   :  { %v27_v12 = vld [vmem:[%s197_s1 + $0x18] sm:$0xff]  ;;  %v26_v13 = vld [vmem:[%s197_s1 + $0x10] sm:$0xff]  ;;  %v25_v14 = vld [vmem:[%s197_s1 + $0x8] sm:$0xff] }
   0x6   :  { %42 = vmatpush.msra.mxu0 %v37_v2  ;;  %98 = vmatpush.msra.mxu1 %v37_v2  ;;  %v24_v15 = vld [vmem:[%s197_s1] sm:$0xff]  ;;  %v74_v17 = vld [vmem:[%s199_s0 + $0x8] sm:$0xff] }
   0x7   :  { %v22_v16 = vld [vmem:[%s199_s0] sm:$0xff] }
   0x8   :  { %43 = vmatpush.msra.mxu0 %v36_v3  ;;  %99 = vmatpush.msra.mxu1 %v36_v3  ;;  %v113_v20 = vld [vmem:[%s198_s2] ss:$0 sm:$0xff] }
   0xa   :  { %44 = vmatpush.msra.mxu0 %v35_v4  ;;  %100 = vmatpush.msra.mxu1 %v35_v4 }
   0xc   :  { %45 = vmatpush.msra.mxu0 %v34_v5  ;;  %101 = vmatpush.msra.mxu1 %v34_v5 }
   0xe   :  { %46 = vmatpush.msra.mxu0 %v33_v6  ;;  %102 = vmatpush.msra.mxu1 %v33_v6 }
  0x10   :  { %47 = vmatpush.msra.mxu0 %v32_v7  ;;  %103 = vmatpush.msra.mxu1 %v32_v7 }
  0x12   :  { %48 = vmatpush.msra.mxu0 %v31_v8  ;;  %104 = vmatpush.msra.mxu1 %v31_v8 }
  0x14   :  { %49 = vmatpush.msra.mxu0 %v30_v9  ;;  %105 = vmatpush.msra.mxu1 %v30_v9 }
  0x16   :  { %50 = vmatpush.msra.mxu0 %v29_v10  ;;  %106 = vmatpush.msra.mxu1 %v29_v10 }
  0x18   :  { %51 = vmatpush.msra.mxu0 %v28_v11  ;;  %107 = vmatpush.msra.mxu1 %v28_v11 }
  0x1a   :  { %52 = vmatpush.msra.mxu0 %v27_v12  ;;  %108 = vmatpush.msra.mxu1 %v27_v12 }
  0x1c   :  { %53 = vmatpush.msra.mxu0 %v26_v13  ;;  %109 = vmatpush.msra.mxu1 %v26_v13 }
  0x1e   :  { %54 = vmatpush.msra.mxu0 %v25_v14  ;;  %110 = vmatpush.msra.mxu1 %v25_v14 }
  0x20   :  { %55 = vmatpush.msra.mxu0 %v24_v15  ;;  %111 = vmatpush.msra.mxu1 %v24_v15 }
  0x21   :  { %56 = vmatmul.f32.vlgmr.msra.gmra.mxu0 %v22_v16  ;;  %59 = vmatmul.f32.vlgmr.msra.gmra.mxu1 %v74_v17 }
  0x9e   :  { %v57_v18 = vpop.f32.mrf.mxu0  ;;  %v60_v19 = vpop.f32.mrf.mxu1 }
  0x9f   :  { %v75_v21 = vadd.f32 %v57_v18, %v22_v16  ;;  %v76_v22 = vadd.f32 %v74_v17, %v60_v19 }
  0xa1   :  { %v88_v23 = vadd.f32 %v113_v20, %v75_v21  ;;  %v89_v24 = vadd.f32 %v113_v20, %v76_v22 }
  0xa3   :  { %90 = vst [vmem:[%s200_s3] sm:$0xff] %v88_v23 }
  0xa4   :  { %91 = vst [vmem:[%s200_s3 + $0x8] sm:$0xff] %v89_v24 }

</bundles_post_ra>
